<compile_context>
chip_gen: v5e
topology: v5e:2x2
jax: 0.10.0
libtpu: 0.0.40
codegen_flags: <defaults>
</compile_context>

<pallas_src>
import functools
import math

import jax
import jax.numpy as jnp
from jax.experimental import pallas as pl
from jax.experimental.pallas import tpu as pltpu


def _mse_with_logits_kernel(logits_ref, target_ref, out_ref, *, approx_recip):
    x = logits_ref[...].astype(jnp.float32)
    t = target_ref[...].astype(jnp.float32)

    if approx_recip:
        # EUP path (exp + approximate reciprocal): keeps VALU slots free where the
        # kernel is close to VALU-bound (16-bit I/O); error << bf16 rounding.
        confidence = pl.reciprocal(1.0 + jnp.exp(-x), approx=True)
    else:
        confidence = jax.nn.sigmoid(x)
    confidence = jnp.clip(confidence, 0.0001, 1.0 - 0.0001)

    diff = t - confidence
    # Single nested select instead of (two selects + add).
    out = jnp.where(t == 1.0, 5.0 * (diff * diff),
                    jnp.where(t == 0.0, confidence * confidence, 0.0))
    out_ref[...] = out.astype(out_ref.dtype)


def _sublane_multiple(*dtypes):
    # f32 -> 8, bf16/f16 -> 16, int8/fp8 -> 32 (packed sublanes).
    m = 8
    for dt in dtypes:
        m = max(m, 32 // jnp.dtype(dt).itemsize)
    return m


def _round_up(x, m):
    return ((x + m - 1) // m) * m


def _default_block_bytes():
    # ~2 MiB/buffer on v5e and older, ~4 MiB on v6e/v7x. The explicit
    # vmem_limit_bytes passed below makes either choice safe on any generation.
    try:
        kind = jax.devices()[0].device_kind.lower()
    except Exception:
        return 2 << 20
    if any(tag in kind for tag in ("v2", "v3", "v4", "v5")):
        return 2 << 20
    return 4 << 20


def mse_with_logits_loss(logits, target, *, out_dtype=None, target_block_bytes=None):
    """Elementwise MSEWithLogitsLoss; output has the same shape as the inputs."""
    assert logits.shape == target.shape, (logits.shape, target.shape)
    orig_shape = logits.shape
    if out_dtype is None:
        out_dtype = jnp.result_type(logits.dtype, target.dtype)
    out_dtype = jnp.dtype(out_dtype)
    if target_block_bytes is None:
        target_block_bytes = _default_block_bytes()

    total = math.prod(orig_shape) if orig_shape else 1
    sub_mult = _sublane_multiple(logits.dtype, target.dtype, out_dtype)
    max_item = max(jnp.dtype(d).itemsize for d in (logits.dtype, target.dtype, out_dtype))
    last = orig_shape[-1] if orig_shape else 1

    # ---- choose a 2D (rows, lane) view ---------------------------------------
    allow_input_fusion = None
    if (len(orig_shape) >= 2 and last % 128 == 0
            and last * max_item * sub_mult <= 8 * target_block_bytes):
        # Native-lane path: collapse leading dims only (metadata-only reshape).
        lane, rows = last, total // last
    elif total % 128 == 0:
        # Flat lane-dense slab; the reshape changes the minor dim, so let XLA
        # fuse any relayout into the kernel's input DMA instead of a copy pass.
        lane = next(c for c in (1024, 512, 256, 128) if total % c == 0)
        rows = total // lane
        allow_input_fusion = [True, True]
    else:
        # Ragged: keep the native trailing dim, tile rows only. No pad/slice
        # passes; narrow lanes only cost masked stores (fine for small tensors).
        # TODO(synk): bulk+tail split for very large ragged tensors.
        if len(orig_shape) >= 2:
            lane, rows = last, total // last
        else:
            lane, rows = total, 1

    l2d = logits.reshape(rows, lane)
    t2d = target.reshape(rows, lane)

    # ---- row tiling -----------------------------------------------------------
    tile_rows = max(1, target_block_bytes // (lane * max_item))
    # Keep >= ~8 grid steps when possible (v7x megacore split + DMA overlap).
    tile_rows = min(tile_rows, max(1, pl.cdiv(rows, 8)))
    if tile_rows >= rows:
        tile_rows = rows                      # single full-extent block is always legal
    else:
        tile_rows = max(sub_mult, _round_up(tile_rows, sub_mult))
        if tile_rows >= rows:
            tile_rows = rows
    grid = (pl.cdiv(rows, tile_rows),)

    # Explicit VMEM budget: 3 operands x 2 buffers + slack, independent of the
    # per-generation scoped default (16 MiB v5e / 32 MiB v6e,v7x / 64 MiB phys v7x).
    block_elems = tile_rows * lane
    live_bytes = 2 * block_elems * (jnp.dtype(logits.dtype).itemsize
                                    + jnp.dtype(target.dtype).itemsize
                                    + out_dtype.itemsize)
    vmem_limit = int(min(max(16 << 20, live_bytes + (4 << 20)), 64 << 20))

    approx_recip = all(jnp.dtype(d).itemsize <= 2
                       for d in (logits.dtype, target.dtype, out_dtype))
    kernel = functools.partial(_mse_with_logits_kernel, approx_recip=approx_recip)

    out2d = pl.pallas_call(
        kernel,
        out_shape=jax.ShapeDtypeStruct((rows, lane), out_dtype),
        grid_spec=pltpu.PrefetchScalarGridSpec(
            num_scalar_prefetch=0,
            grid=grid,
            in_specs=[
                pl.BlockSpec((tile_rows, lane), lambda i: (i, 0)),
                pl.BlockSpec((tile_rows, lane), lambda i: (i, 0)),
            ],
            out_specs=pl.BlockSpec((tile_rows, lane), lambda i: (i, 0)),
        ),
        compiler_params=pltpu.CompilerParams(
            dimension_semantics=("parallel",),
            vmem_limit_bytes=vmem_limit,
            allow_input_fusion=allow_input_fusion,
        ),
    )(l2d, t2d)

    return out2d.reshape(orig_shape)


def _reference(logits, target):
    confidence = jnp.clip(jax.nn.sigmoid(logits.astype(jnp.float32)),
                          0.0001, 1.0 - 0.0001)
    t = target.astype(jnp.float32)
    save = (t == 1.0).astype(jnp.float32)
    mask = (t == 0.0).astype(jnp.float32)
    return 5.0 * save * (t - confidence) ** 2 + mask * confidence ** 2


def _make_inputs(key, shape):
    k1, k2 = jax.random.split(key)
    logits = jax.random.normal(k1, shape, dtype=jnp.float32)
    raw = jax.random.uniform(k2, shape)
    # Mix of exact 0.0, exact 1.0, and other values (as the loss expects).
    target = jnp.where(raw < 0.3, 0.0, jnp.where(raw < 0.6, 1.0, raw))
    return logits, target


if __name__ == "__main__":
    key = jax.random.PRNGKey(0)
    k1, k2, k3, k4 = jax.random.split(key, 4)

    # 1) NCHW-like shape (flat lane-dense path, total % 128 == 0), under jit.
    fn = jax.jit(mse_with_logits_loss)
    logits, target = _make_inputs(k1, (2, 4, 16, 16))
    out = fn(logits, target)
    jax.block_until_ready(out)
    assert out.shape == logits.shape
    assert jnp.allclose(out, _reference(logits, target), atol=1e-6, rtol=1e-5), \
        "mismatch (flat path)"

    # 2) Native 128-multiple trailing dim, multi-step grid with a masked partial
    #    last row-block (small forced block size).
    l2, t2 = _make_inputs(k2, (3, 5, 8, 128))
    o2 = mse_with_logits_loss(l2, t2, target_block_bytes=16 * 128 * 4)
    jax.block_until_ready(o2)
    assert jnp.allclose(o2, _reference(l2, t2), atol=1e-6, rtol=1e-5), \
        "mismatch (native-lane path, partial block)"

    # 3) Ragged size: native trailing dim, no pad/slice copies, masked lanes.
    l3, t3 = _make_inputs(k3, (2, 3, 7, 13))
    o3 = mse_with_logits_loss(l3, t3)
    jax.block_until_ready(o3)
    assert jnp.allclose(o3, _reference(l3, t3), atol=1e-6, rtol=1e-5), \
        "mismatch (ragged path)"

    # 4) bf16 in / bf16 out: exercises the EUP approx-reciprocal sigmoid path.
    l4, t4 = _make_inputs(k4, (2, 4, 8, 256))
    l4 = l4.astype(jnp.bfloat16)
    t4 = t4.astype(jnp.bfloat16)
    o4 = mse_with_logits_loss(l4, t4)
    jax.block_until_ready(o4)
    assert o4.dtype == jnp.bfloat16
    assert jnp.allclose(o4.astype(jnp.float32), _reference(l4, t4),
                        atol=3e-2, rtol=3e-2), "mismatch (bf16 path)"

    print("KERNEL_OK")
</pallas_src>

<mosaic_0001>
module attributes {stable_mosaic.version = 11 : i64} {
  func.func @_mse_with_logits_kernel(%arg0: i32, %arg1: memref<2x1024xf32, #tpu.memory_space<vmem>>, %arg2: memref<2x1024xf32, #tpu.memory_space<vmem>>, %arg3: memref<2x1024xf32, #tpu.memory_space<vmem>>) attributes {dimension_semantics = [#tpu.dimension_semantics<parallel>], iteration_bounds = array<i64: 1>, scalar_prefetch = 0 : i64, scratch_operands = 0 : i64, tpu.core_type = #tpu.core_type<tc>, window_params = [{transform_indices = @transform_0, window_bounds = array<i64: 2, 1024>}, {transform_indices = @transform_1, window_bounds = array<i64: 2, 1024>}, {transform_indices = @transform_2, window_bounds = array<i64: 2, 1024>}]} {
    %c0 = arith.constant 0 : index
    %c0_0 = arith.constant 0 : index
    %0 = vector.load %arg1[%c0, %c0_0] : memref<2x1024xf32, #tpu.memory_space<vmem>>, vector<2x1024xf32>
    %c0_1 = arith.constant 0 : index
    %c0_2 = arith.constant 0 : index
    %1 = vector.load %arg2[%c0_1, %c0_2] : memref<2x1024xf32, #tpu.memory_space<vmem>>, vector<2x1024xf32>
    %2 = arith.negf %0 : vector<2x1024xf32>
    %3 = math.exp %2 : vector<2x1024xf32>
    %cst = arith.constant 1.000000e+00 : f32
    %4 = vector.broadcast %cst : f32 to vector<2x1024xf32>
    %5 = arith.addf %4, %3 : vector<2x1024xf32>
    %6 = arith.divf %4, %5 : vector<2x1024xf32>
    %cst_3 = arith.constant 9.99999974E-5 : f32
    %cst_4 = arith.constant 0.999899983 : f32
    %7 = vector.broadcast %cst_3 : f32 to vector<2x1024xf32>
    %8 = arith.maximumf %7, %6 : vector<2x1024xf32>
    %9 = vector.broadcast %cst_4 : f32 to vector<2x1024xf32>
    %10 = arith.minimumf %9, %8 : vector<2x1024xf32>
    %11 = arith.subf %1, %10 : vector<2x1024xf32>
    %cst_5 = arith.constant 1.000000e+00 : f32
    %12 = vector.broadcast %cst_5 : f32 to vector<2x1024xf32>
    %13 = arith.cmpf oeq, %1, %12 : vector<2x1024xf32>
    %14 = arith.mulf %11, %11 : vector<2x1024xf32>
    %cst_6 = arith.constant 5.000000e+00 : f32
    %15 = vector.broadcast %cst_6 : f32 to vector<2x1024xf32>
    %16 = arith.mulf %15, %14 : vector<2x1024xf32>
    %cst_7 = arith.constant 0.000000e+00 : f32
    %17 = vector.broadcast %cst_7 : f32 to vector<2x1024xf32>
    %18 = arith.cmpf oeq, %1, %17 : vector<2x1024xf32>
    %19 = arith.mulf %10, %10 : vector<2x1024xf32>
    %cst_8 = arith.constant 0.000000e+00 : f32
    %20 = vector.broadcast %cst_8 : f32 to vector<2x1024xf32>
    %21 = arith.select %18, %19, %20 : vector<2x1024xi1>, vector<2x1024xf32>
    %22 = arith.select %13, %16, %21 : vector<2x1024xi1>, vector<2x1024xf32>
    %c0_9 = arith.constant 0 : index
    %c0_10 = arith.constant 0 : index
    %23 = vector.load %arg3[%c0_9, %c0_10] : memref<2x1024xf32, #tpu.memory_space<vmem>>, vector<2x1024xf32>
    tpu.vector_store %arg3[%c0_9, %c0_10], %22 {strides = array<i32>} : memref<2x1024xf32, #tpu.memory_space<vmem>>, vector<2x1024xf32>,
    return
  }
  func.func @transform_0(%arg0: i32) -> (i32, i32) {
    %c0_i32 = arith.constant 0 : i32
    %c0_i32_0 = arith.constant 0 : i32
    return %arg0, %c0_i32 : i32, i32
  }
  func.func @transform_1(%arg0: i32) -> (i32, i32) {
    %c0_i32 = arith.constant 0 : i32
    %c0_i32_0 = arith.constant 0 : i32
    return %arg0, %c0_i32 : i32, i32
  }
  func.func @transform_2(%arg0: i32) -> (i32, i32) {
    %c0_i32 = arith.constant 0 : i32
    %c0_i32_0 = arith.constant 0 : i32
    return %arg0, %c0_i32 : i32, i32
  }
}

</mosaic_0001>

<bundles_post_ra>
// kernel: mse_with_logits_loss.1
= control target key start
LH: loop header
LB: loop body
LE: loop exit
PB: predicated region body
PF: predicated region fallthrough
CT: control target
= control target key end

     0   :  { %s122_s0 = inlined_call_operand.vmem [shape: f32[2,1024], index: 0, kind: input, shape index: {}]   ;;  %s123_s1 = inlined_call_operand.vmem [shape: f32[2,1024], index: 1, kind: input, shape index: {}]   ;;  %s124_s2 = inlined_call_operand.vmem [shape: f32[2,1024], index: 2, kind: output, shape index: {}]  }
   0x1   :  { %v11_v0 = vld [vmem:[%s122_s0] sm:$0xff]  ;;  %v12_v1 = vld [vmem:[%s122_s0 + $0x8] sm:$0xff] }
   0x2   :  { %v79_v2 = vmul.f32 -1.442695, %v11_v0  ;;  %v80_v3 = vmul.f32 -1.442695, %v12_v1  ;;  %v13_v29 = vld [vmem:[%s123_s1] sm:$0xff]  ;;  %v14_v32 = vld [vmem:[%s123_s1 + $0x8] sm:$0xff] }
   0x3   :  { %vm65_vm8 = vcmp.eq.f32.partialorder %v13_v29, 0.0  ;;  %vm66_vm9 = vcmp.eq.f32.partialorder %v14_v32, 0.0  ;;  %vm59_vm10 = vcmp.eq.f32.partialorder %v13_v29, 1.0  ;;  %vm60_vm11 = vcmp.eq.f32.partialorder %v14_v32, 1.0 }
   0x4   :  { %81 = vpow2.f32 %v79_v2 }
   0x5   :  { %83 = vpow2.f32 %v80_v3 }
   0xa   :  { %v82_v4 = vpop.eup %81 }
   0xb   :  { %v84_v5 = vpop.eup %83  ;;  %v21_v6 = vadd.f32 1.0, %v82_v4 }
   0xc   :  { %v22_v7 = vadd.f32 1.0, %v84_v5 }
   0xd   :  { %85 = vrcp.f32 %v21_v6  ;;  %vm28_vm0 = vweird.f32 %v21_v6  ;;  %v34_v11 = vand.u32 2147483648, %v21_v6  ;;  %v32_v14 = vand.u32 2147483647, %v21_v6 }
   0xe   :  { %87 = vrcp.f32 %v22_v7  ;;  %v49_v15 = vand.u32 2147483648, %v22_v7  ;;  %vm43_vm2 = vweird.f32 %v22_v7  ;;  %v47_v17 = vand.u32 2147483647, %v22_v7 }
   0xf   :  { %v35_v19 = vor.u32 1.1754944e-38, %v34_v11  ;;  %vm33_vm5 = vcmp.eq.f32.partialorder %v32_v14, 8.507059e+37 }
  0x10   :  { %v50_v22 = vor.u32 1.1754944e-38, %v49_v15  ;;  %vm48_vm7 = vcmp.eq.f32.partialorder %v47_v17, 8.507059e+37 }
  0x13   :  { %v86_v8 = vpop.eup %85 }
  0x14   :  { %v88_v9 = vpop.eup %87  ;;  %v24_v10 = vmul.f32 %v86_v8, %v21_v6  ;;  %vm29_vm1 = vweird.f32 %v86_v8 }
  0x15   :  { %v39_v12 = vmul.f32 %v88_v9, %v22_v7  ;;  %vm44_vm3 = vweird.f32 %v88_v9  ;;  %vm30_vm4 = vmor %vm28_vm0, %vm29_vm1 }
  0x16   :  { %v25_v13 = vsub.f32 1.0, %v24_v10  ;;  %vm45_vm6 = vmor %vm43_vm2, %vm44_vm3 }
  0x17   :  { %v40_v16 = vsub.f32 1.0, %v39_v12 }
  0x18   :  { %v26_v18 = vmul.f32 %v86_v8, %v25_v13 }
  0x19   :  { %v41_v20 = vmul.f32 %v88_v9, %v40_v16 }
  0x1a   :  { %v27_v21 = vadd.f32 %v86_v8, %v26_v18 }
  0x1b   :  { %v42_v23 = vadd.f32 %v88_v9, %v41_v20 }
  0x1c   :  { %v31_v24 = vsel %vm30_vm4, %v86_v8, %v27_v21 }
  0x1d   :  { %v36_v25 = vsel %vm33_vm5, %v35_v19, %v31_v24  ;;  %v46_v26 = vsel %vm45_vm6, %v88_v9, %v42_v23 }
  0x1e   :  { %v53_v27 = vmax.f32 %v36_v25, 0.0001  ;;  %v51_v28 = vsel %vm48_vm7, %v50_v22, %v46_v26 }
  0x1f   :  { %v54_v30 = vmax.f32 %v51_v28, 0.0001 }
  0x20   :  { %v55_v31 = vmin.f32 %v53_v27, 0.9999 }
  0x21   :  { %v56_v33 = vmin.f32 %v54_v30, 0.9999 }
  0x22   :  { %v57_v34 = vsub.f32 %v13_v29, %v55_v31  ;;  %v67_v35 = vmul.f32 %v55_v31, %v55_v31 }
  0x23   :  { %v58_v36 = vsub.f32 %v14_v32, %v56_v33  ;;  %v68_v37 = vmul.f32 %v56_v33, %v56_v33 }
  0x24   :  { %v61_v38 = vmul.f32 %v57_v34, %v57_v34  ;;  %v69_v39 = vsel %vm65_vm8, %v67_v35, 0.0 }
  0x25   :  { %v62_v40 = vmul.f32 %v58_v36, %v58_v36  ;;  %v70_v42 = vsel %vm66_vm9, %v68_v37, 0.0 }
  0x26   :  { %v63_v41 = vmul.f32 5.0, %v61_v38 }
  0x27   :  { %v64_v43 = vmul.f32 5.0, %v62_v40 }
  0x28   :  { %v71_v44 = vsel %vm59_vm10, %v63_v41, %v69_v39 }
  0x29   :  { %73 = vst [vmem:[%s124_s2] sm:$0xff] %v71_v44  ;;  %v72_v45 = vsel %vm60_vm11, %v64_v43, %v70_v42 }
  0x2a   :  { %74 = vst [vmem:[%s124_s2 + $0x8] sm:$0xff] %v72_v45 }

</bundles_post_ra>
